<compile_context>
chip_gen: v5e
topology: v5e:2x2
jax: 0.10.0
libtpu: 0.0.40
codegen_flags: <defaults>
</compile_context>

<pallas_src>
import functools

import jax
import jax.numpy as jnp
from jax.experimental import pallas as pl
from jax.experimental.pallas import tpu as pltpu

_LANE = 128
_NEG_BIG = -1e30  # padded-action bias (f32) -> exp() underflows to exactly 0
_MAX_TILE_ROWS = 1024


def _round_up(n, m):
    return (n + m - 1) // m * m


def _policy_kernel(x_ref, w1_ref, b1_ref, w2_ref, b2_ref, out_ref):
    # In-kernel cast of the activation to bf16 for the MXU (f32 accumulate).
    x = x_ref[...].astype(jnp.bfloat16)
    h = jnp.dot(x, w1_ref[...], preferred_element_type=jnp.float32)
    h = jnp.maximum(h + b1_ref[...], 0.0)
    # fc2: re-cast hidden activations to bf16, accumulate in f32, add f32 bias.
    logits = jnp.dot(h.astype(jnp.bfloat16), w2_ref[...],
                     preferred_element_type=jnp.float32) + b2_ref[...]
    # Softmax over the lane-padded action axis. Padded columns carry a -1e30
    # bias, so exp(padded - max) == 0 and the result equals the real softmax.
    m = jnp.max(logits, axis=-1, keepdims=True)
    e = jnp.exp(logits - m)
    denom = jnp.sum(e, axis=-1, keepdims=True)
    probs = e * pl.reciprocal(denom)            # exact (approx=False) — EUP is idle
    # Store only the real action columns (un-padded output: tiny HBM writeback).
    out_ref[...] = probs[:, :out_ref.shape[1]].astype(out_ref.dtype)


def prepare_params(w1, b1, w2, b2):
    """One-time weight prep (hoisted out of the per-call path).

    w1: [in, hidden], b1: [1, hidden], w2: [hidden, num_actions],
    b2: [1, num_actions] (all f32).  Returns bf16 MXU weights and lane-padded
    f32 biases ready for `policy_network_forward`.
    """
    num_actions = w2.shape[1]
    n_pad = _round_up(num_actions, _LANE)
    w2p = jnp.pad(w2, ((0, 0), (0, n_pad - num_actions)))
    b2p = jnp.pad(b2, ((0, 0), (0, n_pad - num_actions)), constant_values=_NEG_BIG)
    w1b = w1.astype(jnp.bfloat16)
    w2b = w2p.astype(jnp.bfloat16)
    b1f = b1.astype(jnp.float32)
    b2f = b2p.astype(jnp.float32)          # keep -1e30 pad bias in f32
    return w1b, b1f, w2b, b2f


def _pick_tiling(batch):
    """Batch tile size / grid length: 1 step on 1-TC chips, 2 parallel steps on v7x."""
    try:
        kind = jax.devices()[0].device_kind.lower()
    except Exception:  # pragma: no cover - defensive; never expected on TPU
        kind = ""
    n_steps = 2 if ("v7" in kind and batch >= 16) else 1
    # Keep per-step tiles bounded so VMEM is never a concern, even for huge batches.
    n_steps = max(n_steps, -(-_round_up(batch, 8) // _MAX_TILE_ROWS))
    tb = _round_up(-(-batch // n_steps), 8)
    b_pad = tb * n_steps
    return tb, b_pad, n_steps


@functools.partial(jax.jit, static_argnames=("num_actions",))
def policy_network_forward(x, w1b, b1, w2b, b2p, *, num_actions):
    """x: [B, input_size] f32; prepped params from `prepare_params`.
    Returns [B, num_actions] softmax probabilities (f32)."""
    B, in_size = x.shape
    hidden = w1b.shape[1]
    n_pad = w2b.shape[1]

    tb, b_pad, n_steps = _pick_tiling(B)
    xp = x if b_pad == B else jnp.pad(x, ((0, b_pad - B), (0, 0)))

    out = pl.pallas_call(
        _policy_kernel,
        out_shape=jax.ShapeDtypeStruct((b_pad, num_actions), jnp.float32),
        grid=(n_steps,),
        in_specs=[
            pl.BlockSpec((tb, in_size), lambda i: (i, 0)),       # x tile (f32)
            pl.BlockSpec((in_size, hidden), lambda i: (0, 0)),   # w1 (VMEM-resident)
            pl.BlockSpec((1, hidden), lambda i: (0, 0)),         # b1 (VMEM-resident)
            pl.BlockSpec((hidden, n_pad), lambda i: (0, 0)),     # w2 (VMEM-resident)
            pl.BlockSpec((1, n_pad), lambda i: (0, 0)),          # b2 (VMEM-resident)
        ],
        out_specs=pl.BlockSpec((tb, num_actions), lambda i: (i, 0)),
        compiler_params=pltpu.CompilerParams(
            dimension_semantics=("parallel",)),
    )(xp, w1b, b1, w2b, b2p)

    return out if b_pad == B else out[:B]


def init_params(key, input_size=10, hidden_size=128, num_actions=6):
    """Deterministic init mimicking nn.Linear default (uniform +/-1/sqrt(fan_in)).
    Weights stored [in, out] so the kernel computes x @ W (== x @ W_torch.T)."""
    k1, k2, k3, k4 = jax.random.split(key, 4)
    bound1 = 1.0 / jnp.sqrt(jnp.float32(input_size))
    bound2 = 1.0 / jnp.sqrt(jnp.float32(hidden_size))
    w1 = jax.random.uniform(k1, (input_size, hidden_size), jnp.float32, -bound1, bound1)
    b1 = jax.random.uniform(k2, (1, hidden_size), jnp.float32, -bound1, bound1)
    w2 = jax.random.uniform(k3, (hidden_size, num_actions), jnp.float32, -bound2, bound2)
    b2 = jax.random.uniform(k4, (1, num_actions), jnp.float32, -bound2, bound2)
    return w1, b1, w2, b2


def _reference(x, w1, b1, w2, b2):
    h = jnp.maximum(x @ w1 + b1, 0.0)
    return jax.nn.softmax(h @ w2 + b2, axis=-1)


if __name__ == "__main__":
    key = jax.random.PRNGKey(0)
    k_params, k_x1, k_x2 = jax.random.split(key, 3)

    input_size, hidden_size, num_actions = 10, 128, 6
    w1, b1, w2, b2 = init_params(k_params, input_size, hidden_size, num_actions)

    # One-time weight prep, hoisted out of the per-call path.
    w1b, b1f, w2b, b2p = prepare_params(w1, b1, w2, b2)

    # Case 1: moderate batch (exercises the batch-tiled parallel grid).
    x_big = jax.random.normal(k_x1, (32, input_size), jnp.float32)
    probs_big = jax.block_until_ready(
        policy_network_forward(x_big, w1b, b1f, w2b, b2p, num_actions=num_actions))
    ref_big = _reference(x_big, w1, b1, w2, b2)
    assert probs_big.shape == (32, num_actions)
    assert jnp.allclose(probs_big, ref_big, atol=2e-2)           # bf16 MXU tolerance
    assert jnp.allclose(jnp.sum(probs_big, axis=-1), 1.0, atol=2e-3)

    # Case 2: tiny batch (single grid step, no padding needed).
    x_small = jax.random.normal(k_x2, (8, input_size), jnp.float32)
    probs_small = jax.block_until_ready(
        policy_network_forward(x_small, w1b, b1f, w2b, b2p, num_actions=num_actions))
    ref_small = _reference(x_small, w1, b1, w2, b2)
    assert probs_small.shape == (8, num_actions)
    assert jnp.allclose(probs_small, ref_small, atol=2e-2)
    assert jnp.allclose(jnp.sum(probs_small, axis=-1), 1.0, atol=2e-3)

    print("KERNEL_OK")
</pallas_src>

<mosaic_0001>
module attributes {stable_mosaic.version = 11 : i64} {
  func.func @_policy_kernel(%arg0: i32, %arg1: memref<32x10xf32, #tpu.memory_space<vmem>>, %arg2: memref<10x128xbf16, #tpu.memory_space<vmem>>, %arg3: memref<1x128xf32, #tpu.memory_space<vmem>>, %arg4: memref<128x128xbf16, #tpu.memory_space<vmem>>, %arg5: memref<1x128xf32, #tpu.memory_space<vmem>>, %arg6: memref<32x6xf32, #tpu.memory_space<vmem>>) attributes {dimension_semantics = [#tpu.dimension_semantics<parallel>], iteration_bounds = array<i64: 1>, scalar_prefetch = 0 : i64, scratch_operands = 0 : i64, tpu.core_type = #tpu.core_type<tc>, window_params = [{transform_indices = @transform_0, window_bounds = array<i64: 32, 10>}, {pipeline_mode = #tpu.pipeline_mode<synchronous>, transform_indices = @transform_1, window_bounds = array<i64: 10, 128>}, {pipeline_mode = #tpu.pipeline_mode<synchronous>, transform_indices = @transform_2, window_bounds = array<i64: 1, 128>}, {pipeline_mode = #tpu.pipeline_mode<synchronous>, transform_indices = @transform_3, window_bounds = array<i64: 128, 128>}, {pipeline_mode = #tpu.pipeline_mode<synchronous>, transform_indices = @transform_4, window_bounds = array<i64: 1, 128>}, {transform_indices = @transform_5, window_bounds = array<i64: 32, 6>}]} {
    %c0 = arith.constant 0 : index
    %c0_0 = arith.constant 0 : index
    %0 = vector.load %arg1[%c0, %c0_0] : memref<32x10xf32, #tpu.memory_space<vmem>>, vector<32x10xf32>
    %1 = arith.truncf %0 : vector<32x10xf32> to vector<32x10xbf16>
    %c0_1 = arith.constant 0 : index
    %c0_2 = arith.constant 0 : index
    %2 = vector.load %arg2[%c0_1, %c0_2] : memref<10x128xbf16, #tpu.memory_space<vmem>>, vector<10x128xbf16>
    %cst = arith.constant dense<0.000000e+00> : vector<32x128xf32>
    %3 = tpu.matmul %1, %2, %cst {dimension_numbers = #tpu.dot_dimension_numbers<[1], [0], [0], [1], [0, 0, 1, 1], [], []>} : vector<32x10xbf16>, vector<10x128xbf16>, vector<32x128xf32> -> vector<32x128xf32>
    %c0_3 = arith.constant 0 : index
    %c0_4 = arith.constant 0 : index
    %4 = vector.load %arg3[%c0_3, %c0_4] : memref<1x128xf32, #tpu.memory_space<vmem>>, vector<1x128xf32>
    %5 = vector.broadcast %4 : vector<1x128xf32> to vector<32x128xf32>
    %6 = arith.addf %3, %5 : vector<32x128xf32>
    %cst_5 = arith.constant 0.000000e+00 : f32
    %7 = vector.broadcast %cst_5 : f32 to vector<32x128xf32>
    %8 = arith.maximumf %6, %7 : vector<32x128xf32>
    %9 = arith.truncf %8 : vector<32x128xf32> to vector<32x128xbf16>
    %c0_6 = arith.constant 0 : index
    %c0_7 = arith.constant 0 : index
    %10 = vector.load %arg4[%c0_6, %c0_7] : memref<128x128xbf16, #tpu.memory_space<vmem>>, vector<128x128xbf16>
    %cst_8 = arith.constant dense<0.000000e+00> : vector<32x128xf32>
    %11 = tpu.matmul %9, %10, %cst_8 {dimension_numbers = #tpu.dot_dimension_numbers<[1], [0], [0], [1], [0, 0, 1, 1], [], []>} : vector<32x128xbf16>, vector<128x128xbf16>, vector<32x128xf32> -> vector<32x128xf32>
    %c0_9 = arith.constant 0 : index
    %c0_10 = arith.constant 0 : index
    %12 = vector.load %arg5[%c0_9, %c0_10] : memref<1x128xf32, #tpu.memory_space<vmem>>, vector<1x128xf32>
    %13 = vector.broadcast %12 : vector<1x128xf32> to vector<32x128xf32>
    %14 = arith.addf %11, %13 : vector<32x128xf32>
    %cst_11 = arith.constant dense<0xFF800000> : vector<32xf32>
    %15 = vector.multi_reduction <maximumf>, %14, %cst_11 [1] : vector<32x128xf32> to vector<32xf32>
    %16 = vector.shape_cast %15 : vector<32xf32> to vector<32x1xf32>
    %17 = vector.broadcast %16 : vector<32x1xf32> to vector<32x128xf32>
    %18 = arith.subf %14, %17 : vector<32x128xf32>
    %19 = math.exp %18 : vector<32x128xf32>
    %cst_12 = arith.constant dense<0.000000e+00> : vector<32xf32>
    %20 = vector.multi_reduction <add>, %19, %cst_12 [1] : vector<32x128xf32> to vector<32xf32>
    %21 = vector.shape_cast %20 : vector<32xf32> to vector<32x1xf32>
    %22 = tpu.reciprocal %21 : vector<32x1xf32> -> vector<32x1xf32>
    %23 = vector.broadcast %22 : vector<32x1xf32> to vector<32x128xf32>
    %24 = arith.mulf %19, %23 : vector<32x128xf32>
    %25 = vector.extract_strided_slice %24 {offsets = [0, 0], sizes = [32, 6], strides = [1, 1]} : vector<32x128xf32> to vector<32x6xf32>
    %c0_13 = arith.constant 0 : index
    %c0_14 = arith.constant 0 : index
    %26 = vector.load %arg6[%c0_13, %c0_14] : memref<32x6xf32, #tpu.memory_space<vmem>>, vector<32x6xf32>
    tpu.vector_store %arg6[%c0_13, %c0_14], %25 {strides = array<i32>} : memref<32x6xf32, #tpu.memory_space<vmem>>, vector<32x6xf32>,
    return
  }
  func.func @transform_0(%arg0: i32) -> (i32, i32) {
    %c0_i32 = arith.constant 0 : i32
    %c0_i32_0 = arith.constant 0 : i32
    return %arg0, %c0_i32 : i32, i32
  }
  func.func @transform_1(%arg0: i32) -> (i32, i32) {
    %c0_i32 = arith.constant 0 : i32
    %c0_i32_0 = arith.constant 0 : i32
    %c0_i32_1 = arith.constant 0 : i32
    return %c0_i32, %c0_i32_0 : i32, i32
  }
  func.func @transform_2(%arg0: i32) -> (i32, i32) {
    %c0_i32 = arith.constant 0 : i32
    %c0_i32_0 = arith.constant 0 : i32
    %c0_i32_1 = arith.constant 0 : i32
    return %c0_i32, %c0_i32_0 : i32, i32
  }
  func.func @transform_3(%arg0: i32) -> (i32, i32) {
    %c0_i32 = arith.constant 0 : i32
    %c0_i32_0 = arith.constant 0 : i32
    %c0_i32_1 = arith.constant 0 : i32
    return %c0_i32, %c0_i32_0 : i32, i32
  }
  func.func @transform_4(%arg0: i32) -> (i32, i32) {
    %c0_i32 = arith.constant 0 : i32
    %c0_i32_0 = arith.constant 0 : i32
    %c0_i32_1 = arith.constant 0 : i32
    return %c0_i32, %c0_i32_0 : i32, i32
  }
  func.func @transform_5(%arg0: i32) -> (i32, i32) {
    %c0_i32 = arith.constant 0 : i32
    %c0_i32_0 = arith.constant 0 : i32
    return %arg0, %c0_i32 : i32, i32
  }
}

</mosaic_0001>

<bundles_post_ra>
// kernel: policy_network_forward.1
= control target key start
LH: loop header
LB: loop body
LE: loop exit
PB: predicated region body
PF: predicated region fallthrough
CT: control target
= control target key end

     0   :  { %10 = vsyncpa [#allocation3], 0  ;;  %s377_s21 = smov [#allocation2]   ;;  %s378_s23 = smov 64   ;;  %s463_s0 = inlined_call_operand.vmem [shape: f32[32,10], index: 0, kind: input, shape index: {}]   ;;  %s464_s1 = inlined_call_operand.vmem [shape: bf16[10,128], index: 1, kind: input, shape index: {}]   ;;  %s465_s2 = inlined_call_operand.vmem [shape: f32[1,128], index: 2, kind: input, shape index: {}]   ;;  %s466_s3 = inlined_call_operand.hbm [shape: bf16[128,128], index: 3, kind: input, shape index: {}]   ;;  %s467_s4 = inlined_call_operand.vmem [shape: f32[1,128], index: 4, kind: input, shape index: {}]   ;;  %s468_s5 = inlined_call_operand.vmem [shape: f32[32,6], index: 5, kind: output, shape index: {}]  }
   0x1   :  { %s21_s20 = sshll.u32 %s466_s3, 4  ;;  %s23_s22 = sshll.u32 %s377_s21, 4  ;;  %s22_s20 = int_to_ptr.hbm [resolvable:$true] %s21_s20  ;;  %s24_s22 = int_to_ptr.vmem [resolvable:$true] %s23_s22 }
   0x2   :  { %s379_s24 = smov 4  }
   0x3   :  { %29 = dma.hbm_to_vmem [thread:$0]  %s22_s20, 1024, %s24_s22, [#allocation3], %s378_s23, %s378_s23, %s379_s24  }
   0x4   :  { %375 = dma.done.wait [#allocation3], 1024  }
   0x5   :  { %376 = vsyncadd [#allocation3], 4294966272  ;;  %v277_v0 = vld [vmem:[%s464_s1] sm:$0xf]  ;;  %v313_v1 = vld [vmem:[%s464_s1] sm:$0x10] }
   0x6   :  { %vm61_vm0 = vcmask 1044480   ;;  %v37_v2 = vld [vmem:[%s463_s0] sm:$0xff]  ;;  %v278_v3 = vor.u32 %v313_v1, %v277_v0  ;;  %v38_v4 = vld [vmem:[%s463_s0 + $0x8] sm:$0xff]  ;;  %v321_v5 = vld [vmem:[#allocation2 + $0x38] sm:$0xff]  ;;  %vm54_vm1 = vcmask 80896   ;;  %vm265_vm6 = vcmask 48128  }
   0x7   :  { %v41_v7 = vpack.c.bf16 %v38_v4, %v37_v2  ;;  %158 = vmatpush.bf16.msra.mxu1 %v321_v5  ;;  %v320_v8 = vld [vmem:[#allocation2 + $0x30] sm:$0xff]  ;;  %322 = vmatpush.bf16.msra.mxu2 %v321_v5  ;;  %v319_v9 = vld [vmem:[#allocation2 + $0x28] sm:$0xff]  ;;  %v318_v10 = vld [vmem:[#allocation2 + $0x20] sm:$0xff] }
   0x8   :  { %v63_v6 = vsel %vm61_vm0, %v278_v3, 0  ;;  %v39_v11 = vld [vmem:[%s463_s0 + $0x10] sm:$0xff]  ;;  %v40_v12 = vld [vmem:[%s463_s0 + $0x18] sm:$0xff]  ;;  %v315_v16 = vld [vmem:[#allocation2 + $0x8] sm:$0xff] }
   0x9   :  { %72 = vmatpush.bf16.msra.mxu0 %v63_v6  ;;  %v42_v13 = vpack.c.bf16 %v40_v12, %v39_v11  ;;  %v317_v14 = vld [vmem:[#allocation2 + $0x18] sm:$0xff]  ;;  %v316_v15 = vld [vmem:[#allocation2 + $0x10] sm:$0xff]  ;;  %v314_v17 = vld [vmem:[#allocation2] sm:$0xff] }
   0xa   :  { %v333_v19 = vld [vmem:[%s465_s2] ss:$0 sm:$0xff] }
   0xb   :  { %159 = vmatpush.bf16.msra.mxu1 %v320_v8  ;;  %323 = vmatpush.bf16.msra.mxu2 %v320_v8  ;;  %v334_v33 = vld [vmem:[%s467_s4] ss:$0 sm:$0xff] }
   0xc   :  { %279 = vmatmul.msk.bf16.vlgmr.msra.gmra.mxu0 %vm54_vm1, %v41_v7 }
   0xf   :  { %160 = vmatpush.bf16.msra.mxu1 %v319_v9  ;;  %324 = vmatpush.bf16.msra.mxu2 %v319_v9 }
  0x13   :  { %161 = vmatpush.bf16.msra.mxu1 %v318_v10  ;;  %325 = vmatpush.bf16.msra.mxu2 %v318_v10 }
  0x17   :  { %162 = vmatpush.bf16.msra.mxu1 %v317_v14  ;;  %326 = vmatpush.bf16.msra.mxu2 %v317_v14 }
  0x1b   :  { %163 = vmatpush.bf16.msra.mxu1 %v316_v15  ;;  %327 = vmatpush.bf16.msra.mxu2 %v316_v15 }
  0x1c   :  { %280 = vmatmul.msk.bf16.gmra.mxu0 %vm54_vm1, %v42_v13 }
  0x1f   :  { %164 = vmatpush.bf16.msra.mxu1 %v315_v16  ;;  %328 = vmatpush.bf16.msra.mxu2 %v315_v16 }
  0x23   :  { %165 = vmatpush.bf16.msra.mxu1 %v314_v17  ;;  %329 = vmatpush.bf16.msra.mxu2 %v314_v17 }
  0x89   :  { %v74_v18 = vpop.f32.mrf.mxu0 }
  0x8a   :  { %v75_v20 = vadd.f32 %v333_v19, %v74_v18 }
  0x8c   :  { %v84_v23 = vmax.f32 %v75_v20, 0.0 }
  0x91   :  { %v76_v21 = vpop.f32.mrf.mxu0 }
  0x92   :  { %v77_v22 = vadd.f32 %v333_v19, %v76_v21 }
  0x94   :  { %v85_v24 = vmax.f32 %v77_v22, 0.0 }
  0x96   :  { %v88_v25 = vpack.c.bf16 %v85_v24, %v84_v23 }
  0x98   :  { %166 = vmatmul.bf16.vlgmr.msra.gmra.mxu1 %v88_v25 }
  0x99   :  { %v79_v26 = vpop.f32.mrf.mxu0 }
  0x9a   :  { %v80_v27 = vadd.f32 %v333_v19, %v79_v26 }
  0x9c   :  { %v86_v30 = vmax.f32 %v80_v27, 0.0 }
  0xa1   :  { %v81_v28 = vpop.f32.mrf.mxu0 }
  0xa2   :  { %v82_v29 = vadd.f32 %v333_v19, %v81_v28 }
  0xa4   :  { %v87_v31 = vmax.f32 %v82_v29, 0.0 }
  0xa6   :  { %v89_v32 = vpack.c.bf16 %v87_v31, %v86_v30 }
  0xa8   :  { %171 = vmatmul.bf16.vlgmr.msra.gmra.mxu2 %v89_v32 }
 0x115   :  { %v167_v34 = vpop.f32.mrf.mxu1 }
 0x116   :  { %v168_v35 = vadd.f32 %v334_v33, %v167_v34 }
 0x118   :  { %177 = vmax.xlane.f32.xlu0 %v168_v35 }
 0x11d   :  { %v169_v36 = vpop.f32.mrf.mxu1 }
 0x11e   :  { %v170_v37 = vadd.f32 %v334_v33, %v169_v36 }
 0x120   :  { %179 = vmax.xlane.f32.xlu0 %v170_v37 }
 0x12b   :  { %v172_v38 = vpop.f32.mrf.mxu2 }
 0x12c   :  { %v173_v39 = vadd.f32 %v334_v33, %v172_v38 }
 0x12e   :  { %181 = vmax.xlane.f32.xlu1 %v173_v39 }
 0x133   :  { %v174_v40 = vpop.f32.mrf.mxu2 }
 0x134   :  { %v175_v41 = vadd.f32 %v334_v33, %v174_v40 }
 0x136   :  { %183 = vmax.xlane.f32.xlu1 %v175_v41 }
 0x18b   :  { %v178_v42 = vpop.xlane.xlu0 %177 }
 0x18c   :  { %v185_v43 = vsub.f32 %v168_v35, %v178_v42 }
 0x18e   :  { %v189_v44 = vmul.f32 1.442695, %v185_v43 }
 0x190   :  { %335 = vpow2.f32 %v189_v44 }
 0x193   :  { %v180_v45 = vpop.xlane.xlu0 %179 }
 0x194   :  { %v186_v46 = vsub.f32 %v170_v37, %v180_v45 }
 0x196   :  { %v336_v47 = vpop.eup %335  ;;  %v191_v48 = vmul.f32 1.442695, %v186_v46 }
 0x197   :  { %197 = vadd.xlane.f32.xlu2 %v336_v47 }
 0x198   :  { %337 = vpow2.f32 %v191_v48 }
 0x19e   :  { %v338_v49 = vpop.eup %337 }
 0x19f   :  { %199 = vadd.xlane.f32.xlu2 %v338_v49 }
 0x1a1   :  { %v182_v50 = vpop.xlane.xlu1 %181 }
 0x1a2   :  { %v187_v51 = vsub.f32 %v173_v39, %v182_v50 }
 0x1a4   :  { %v193_v52 = vmul.f32 1.442695, %v187_v51 }
 0x1a6   :  { %339 = vpow2.f32 %v193_v52 }
 0x1a9   :  { %v184_v53 = vpop.xlane.xlu1 %183 }
 0x1aa   :  { %v188_v54 = vsub.f32 %v175_v41, %v184_v53 }
 0x1ac   :  { %v439_v55 = vpop.eup %339  ;;  %v195_v56 = vmul.f32 1.442695, %v188_v54 }
 0x1ad   :  { %201 = vadd.xlane.f32.xlu0 %v439_v55 }
 0x1ae   :  { %341 = vpow2.f32 %v195_v56 }
 0x1b4   :  { %v442_v57 = vpop.eup %341 }
 0x1b5   :  { %203 = vadd.xlane.f32.xlu1 %v442_v57 }
 0x20a   :  { %v198_v58 = vpop.xlane.xlu2 %197 }
 0x20b   :  { %343 = vrcp.f32 %v198_v58  ;;  %v216_v63 = vand.u32 2147483648, %v198_v58  ;;  %v214_v1 = vand.u32 2147483647, %v198_v58  ;;  %vm210_vm3 = vweird.f32 %v198_v58 }
 0x20d   :  { %v217_v4 = vor.u32 1.1754944e-38, %v216_v63  ;;  %vm215_vm5 = vcmp.eq.f32.partialorder %v214_v1, 8.507059e+37 }
 0x211   :  { %v344_v59 = vpop.eup %343 }
 0x212   :  { %v206_v60 = vmul.f32 %v344_v59, %v198_v58  ;;  %v200_v61 = vpop.xlane.xlu2 %199  ;;  %vm211_vm2 = vweird.f32 %v344_v59 }
 0x213   :  { %345 = vrcp.f32 %v200_v61  ;;  %vm212_vm4 = vmor %vm210_vm3, %vm211_vm2  ;;  %v230_v10 = vand.u32 2147483648, %v200_v61  ;;  %v228_v12 = vand.u32 2147483647, %v200_v61  ;;  %vm224_vm8 = vweird.f32 %v200_v61 }
 0x214   :  { %v207_v62 = vsub.f32 1.0, %v206_v60 }
 0x215   :  { %v231_v15 = vor.u32 1.1754944e-38, %v230_v10  ;;  %vm229_vm10 = vcmp.eq.f32.partialorder %v228_v12, 8.507059e+37 }
 0x216   :  { %v208_v0 = vmul.f32 %v344_v59, %v207_v62 }
 0x218   :  { %v209_v2 = vadd.f32 %v344_v59, %v208_v0 }
 0x219   :  { %v346_v3 = vpop.eup %345 }
 0x21a   :  { %v213_v5 = vsel %vm212_vm4, %v344_v59, %v209_v2  ;;  %v220_v6 = vmul.f32 %v346_v3, %v200_v61  ;;  %vm225_vm7 = vweird.f32 %v346_v3 }
 0x21b   :  { %v218_v7 = vsel %vm215_vm5, %v217_v4, %v213_v5  ;;  %vm226_vm9 = vmor %vm224_vm8, %vm225_vm7 }
 0x21c   :  { %v261_v8 = vmul.f32 %v336_v47, %v218_v7  ;;  %v221_v9 = vsub.f32 1.0, %v220_v6 }
 0x21e   :  { %266 = vst.msk [vmem:[%s468_s5] sm:$0xff] %vm265_vm6, %v261_v8  ;;  %v222_v11 = vmul.f32 %v346_v3, %v221_v9 }
 0x220   :  { %v223_v13 = vadd.f32 %v346_v3, %v222_v11  ;;  %v202_v14 = vpop.xlane.xlu0 %201 }
 0x221   :  { %347 = vrcp.f32 %v202_v14  ;;  %v244_v23 = vand.u32 2147483648, %v202_v14  ;;  %v242_v25 = vand.u32 2147483647, %v202_v14  ;;  %vm238_vm12 = vweird.f32 %v202_v14 }
 0x222   :  { %v227_v16 = vsel %vm226_vm9, %v346_v3, %v223_v13 }
 0x223   :  { %v232_v17 = vsel %vm229_vm10, %v231_v15, %v227_v16  ;;  %v245_v28 = vor.u32 1.1754944e-38, %v244_v23  ;;  %vm243_vm14 = vcmp.eq.f32.partialorder %v242_v25, 8.507059e+37 }
 0x224   :  { %v262_v18 = vmul.f32 %v338_v49, %v232_v17 }
 0x226   :  { %267 = vst.msk [vmem:[%s468_s5 + $0x8] sm:$0xff] %vm265_vm6, %v262_v18 }
 0x227   :  { %v348_v19 = vpop.eup %347 }
 0x228   :  { %v234_v20 = vmul.f32 %v348_v19, %v202_v14  ;;  %v204_v21 = vpop.xlane.xlu1 %203  ;;  %vm239_vm11 = vweird.f32 %v348_v19 }
 0x229   :  { %349 = vrcp.f32 %v204_v21  ;;  %vm240_vm13 = vmor %vm238_vm12, %vm239_vm11  ;;  %v258_v34 = vand.u32 2147483648, %v204_v21  ;;  %v256_v36 = vand.u32 2147483647, %v204_v21  ;;  %vm252_vm0 = vweird.f32 %v204_v21 }
 0x22a   :  { %v235_v22 = vsub.f32 1.0, %v234_v20 }
 0x22b   :  { %v259_v38 = vor.u32 1.1754944e-38, %v258_v34  ;;  %vm257_vm2 = vcmp.eq.f32.partialorder %v256_v36, 8.507059e+37 }
 0x22c   :  { %v236_v24 = vmul.f32 %v348_v19, %v235_v22 }
 0x22e   :  { %v237_v26 = vadd.f32 %v348_v19, %v236_v24 }
 0x22f   :  { %v350_v27 = vpop.eup %349 }
 0x230   :  { %v241_v29 = vsel %vm240_vm13, %v348_v19, %v237_v26  ;;  %v248_v30 = vmul.f32 %v350_v27, %v204_v21  ;;  %vm253_vm15 = vweird.f32 %v350_v27 }
 0x231   :  { %v246_v31 = vsel %vm243_vm14, %v245_v28, %v241_v29  ;;  %vm254_vm1 = vmor %vm252_vm0, %vm253_vm15 }
 0x232   :  { %v263_v32 = vmul.f32 %v439_v55, %v246_v31  ;;  %v249_v33 = vsub.f32 1.0, %v248_v30 }
 0x234   :  { %268 = vst.msk [vmem:[%s468_s5 + $0x10] sm:$0xff] %vm265_vm6, %v263_v32  ;;  %v250_v35 = vmul.f32 %v350_v27, %v249_v33 }
 0x236   :  { %v251_v37 = vadd.f32 %v350_v27, %v250_v35 }
 0x238   :  { %v255_v39 = vsel %vm254_vm1, %v350_v27, %v251_v37 }
 0x239   :  { %v260_v40 = vsel %vm257_vm2, %v259_v38, %v255_v39 }
 0x23a   :  { %v264_v41 = vmul.f32 %v442_v57, %v260_v40 }
 0x23c   :  { %269 = vst.msk [vmem:[%s468_s5 + $0x18] sm:$0xff] %vm265_vm6, %v264_v41 }
 0x23d   :  { %274 = vsyncpa [#allocation3], 1 }

</bundles_post_ra>
